<compile_context>
chip_gen: v5e
topology: v5e:2x2
jax: 0.10.0
libtpu: 0.0.40
codegen_flags: <defaults>
</compile_context>

<pallas_src>
import functools

import jax
import jax.numpy as jnp
from jax.experimental import pallas as pl
from jax.experimental.pallas import tpu as pltpu

LOG_SIG_MAX = 2.0
LOG_SIG_MIN = -20.0
_LANE = 128


def _round_up(x, m):
    return ((x + m - 1) // m) * m


def _policy_kernel(x_ref, w1_ref, b1_ref, w2_ref, b2_ref, wh_ref, bh_ref,
                   out_ref, *, num_actions):
    # bf16 operands on the MXU, f32 accumulation; elementwise math stays f32.
    x = x_ref[...].astype(jnp.bfloat16)

    # linear1 + relu
    h1 = jnp.dot(x, w1_ref[...], preferred_element_type=jnp.float32) + b1_ref[...]
    h1 = jnp.maximum(h1, 0.0)

    # linear2 + relu
    h2 = jnp.dot(h1.astype(jnp.bfloat16), w2_ref[...],
                 preferred_element_type=jnp.float32) + b2_ref[...]
    h2 = jnp.maximum(h2, 0.0)

    # fused mean/log_std heads: one lane-dense [TB, out_pad] matmul
    head = jnp.dot(h2.astype(jnp.bfloat16), wh_ref[...],
                   preferred_element_type=jnp.float32) + bh_ref[...]

    # clamp only the log_std columns [A, 2A) of the packed slab
    col = jax.lax.broadcasted_iota(jnp.int32, head.shape, 1)
    is_log_std = (col >= num_actions) & (col < 2 * num_actions)
    head = jnp.where(is_log_std,
                     jnp.clip(head, LOG_SIG_MIN, LOG_SIG_MAX),
                     head)

    out_ref[...] = head.astype(out_ref.dtype)


def gaussian_policy_forward(state, params, *, max_block_b=512):
    """Pallas forward pass. state: [B, num_inputs] float32 -> (mean, log_std)."""
    w1, b1, w2, b2, wm, bm, ws, bs = params
    B, num_inputs = state.shape
    hidden = w1.shape[1]
    A = wm.shape[1]

    # --- fuse the two heads and pad the output to a full 128-lane slab ---
    w_head = jnp.concatenate([wm, ws], axis=1)          # [hidden, 2A]
    b_head = jnp.concatenate([bm, bs], axis=1)          # [1, 2A]
    out_pad = _round_up(2 * A, _LANE)
    pad_cols = out_pad - 2 * A
    if pad_cols:
        w_head = jnp.pad(w_head, ((0, 0), (0, pad_cols)))
        b_head = jnp.pad(b_head, ((0, 0), (0, pad_cols)))

    # bf16 weights -> half the weight DMA; biases stay f32 for the f32 adds.
    w1_b = w1.astype(jnp.bfloat16)
    w2_b = w2.astype(jnp.bfloat16)
    wh_b = w_head.astype(jnp.bfloat16)

    # --- batch tiling: pipelined state/out tiles, VMEM-resident weights ---
    TB = min(max_block_b, _round_up(B, 8))              # multiple of 8 (sublanes)
    Bp = _round_up(B, TB)
    state_p = state if Bp == B else jnp.pad(state, ((0, Bp - B), (0, 0)))
    grid = (Bp // TB,)

    # Explicit VMEM budget (weights x2 buffers + double-buffered tiles + live
    # intermediates + headroom), clamped to stay portable to v7x's 64 MiB VMEM.
    f32b, bf16b = 4, 2
    weight_bytes = ((num_inputs * hidden + hidden * hidden + hidden * out_pad) * bf16b
                    + (2 * hidden + out_pad) * f32b)
    tile_bytes = 2 * (TB * num_inputs * f32b) + 2 * (TB * out_pad * f32b)
    live_bytes = TB * (2 * hidden + out_pad) * f32b
    budget = 2 * weight_bytes + tile_bytes + live_bytes + (8 << 20)
    vmem_limit = int(min(48 << 20, max(16 << 20, budget)))

    kernel = functools.partial(_policy_kernel, num_actions=A)

    packed = pl.pallas_call(
        kernel,
        out_shape=jax.ShapeDtypeStruct((Bp, out_pad), jnp.float32),
        grid=grid,
        in_specs=[
            pl.BlockSpec((TB, num_inputs), lambda i: (i, 0)),   # state tile
            pl.BlockSpec(w1_b.shape, lambda i: (0, 0)),         # weights: constant
            pl.BlockSpec(b1.shape, lambda i: (0, 0)),
            pl.BlockSpec(w2_b.shape, lambda i: (0, 0)),
            pl.BlockSpec(b2.shape, lambda i: (0, 0)),
            pl.BlockSpec(wh_b.shape, lambda i: (0, 0)),
            pl.BlockSpec(b_head.shape, lambda i: (0, 0)),
        ],
        out_specs=pl.BlockSpec((TB, out_pad), lambda i: (i, 0)),
        compiler_params=pltpu.CompilerParams(
            dimension_semantics=("parallel",),                  # megacore / v7x 2-TC
            vmem_limit_bytes=vmem_limit,
        ),
    )(state_p, w1_b, b1, w2_b, b2, wh_b, b_head)

    mean = packed[:B, :A]
    log_std = packed[:B, A:2 * A]
    return mean, log_std


def _xavier_uniform(key, fan_in, fan_out, gain=1.0):
    bound = gain * jnp.sqrt(6.0 / (fan_in + fan_out))
    # Stored as [in, out] (transposed vs PyTorch's [out, in]) so y = x @ W + b.
    return jax.random.uniform(key, (fan_in, fan_out), jnp.float32,
                              minval=-bound, maxval=bound)


def init_params(key, num_inputs, num_actions, hidden_dim):
    k1, k2, k3, k4 = jax.random.split(key, 4)
    w1 = _xavier_uniform(k1, num_inputs, hidden_dim)
    b1 = jnp.zeros((1, hidden_dim), jnp.float32)
    w2 = _xavier_uniform(k2, hidden_dim, hidden_dim)
    b2 = jnp.zeros((1, hidden_dim), jnp.float32)
    wm = _xavier_uniform(k3, hidden_dim, num_actions)
    bm = jnp.zeros((1, num_actions), jnp.float32)
    ws = _xavier_uniform(k4, hidden_dim, num_actions)
    bs = jnp.zeros((1, num_actions), jnp.float32)
    return (w1, b1, w2, b2, wm, bm, ws, bs)


def reference_forward(state, params, matmul_dtype=jnp.float32):
    """Pure-JAX reference. matmul_dtype=bf16 mimics the kernel's MXU numerics."""
    w1, b1, w2, b2, wm, bm, ws, bs = params
    md = matmul_dtype

    def mm(a, w):
        return jnp.dot(a.astype(md), w.astype(md),
                       preferred_element_type=jnp.float32)

    h1 = jnp.maximum(mm(state, w1) + b1, 0.0)
    h2 = jnp.maximum(mm(h1, w2) + b2, 0.0)
    mean = mm(h2, wm) + bm
    log_std = jnp.clip(mm(h2, ws) + bs, LOG_SIG_MIN, LOG_SIG_MAX)
    return mean, log_std


if __name__ == "__main__":
    # Small shapes consistent with the module's forward.
    batch = 8
    num_inputs = 16
    num_actions = 8
    hidden_dim = 32

    key = jax.random.PRNGKey(0)
    k_state, k_params = jax.random.split(key)

    state = jax.random.normal(k_state, (batch, num_inputs), jnp.float32)
    params = init_params(k_params, num_inputs, num_actions, hidden_dim)

    mean, log_std = gaussian_policy_forward(state, params)
    jax.block_until_ready((mean, log_std))
    assert mean.shape == (batch, num_actions)
    assert log_std.shape == (batch, num_actions)

    # Tight check against a reference with the same bf16-operand / f32-accumulate
    # matmul numerics as the kernel.
    mean_bf, log_std_bf = reference_forward(state, params, matmul_dtype=jnp.bfloat16)
    assert jnp.allclose(mean, mean_bf, atol=1e-4, rtol=1e-4), \
        float(jnp.max(jnp.abs(mean - mean_bf)))
    assert jnp.allclose(log_std, log_std_bf, atol=1e-4, rtol=1e-4), \
        float(jnp.max(jnp.abs(log_std - log_std_bf)))

    # Loose sanity check against the pure-f32 reference (bf16 operand rounding).
    mean_f32, log_std_f32 = reference_forward(state, params)
    assert jnp.allclose(mean, mean_f32, atol=1e-1, rtol=1e-1)
    assert jnp.allclose(log_std, log_std_f32, atol=1e-1, rtol=1e-1)

    print("KERNEL_OK")
</pallas_src>

<mosaic_0001>
module attributes {stable_mosaic.version = 11 : i64} {
  func.func @_policy_kernel(%arg0: i32, %arg1: memref<8x16xf32, #tpu.memory_space<vmem>>, %arg2: memref<16x32xbf16, #tpu.memory_space<vmem>>, %arg3: memref<1x32xf32, #tpu.memory_space<vmem>>, %arg4: memref<32x32xbf16, #tpu.memory_space<vmem>>, %arg5: memref<1x32xf32, #tpu.memory_space<vmem>>, %arg6: memref<32x128xbf16, #tpu.memory_space<vmem>>, %arg7: memref<1x128xf32, #tpu.memory_space<vmem>>, %arg8: memref<8x128xf32, #tpu.memory_space<vmem>>) attributes {dimension_semantics = [#tpu.dimension_semantics<parallel>], iteration_bounds = array<i64: 1>, scalar_prefetch = 0 : i64, scratch_operands = 0 : i64, tpu.core_type = #tpu.core_type<tc>, window_params = [{transform_indices = @transform_0, window_bounds = array<i64: 8, 16>}, {pipeline_mode = #tpu.pipeline_mode<synchronous>, transform_indices = @transform_1, window_bounds = array<i64: 16, 32>}, {pipeline_mode = #tpu.pipeline_mode<synchronous>, transform_indices = @transform_2, window_bounds = array<i64: 1, 32>}, {pipeline_mode = #tpu.pipeline_mode<synchronous>, transform_indices = @transform_3, window_bounds = array<i64: 32, 32>}, {pipeline_mode = #tpu.pipeline_mode<synchronous>, transform_indices = @transform_4, window_bounds = array<i64: 1, 32>}, {pipeline_mode = #tpu.pipeline_mode<synchronous>, transform_indices = @transform_5, window_bounds = array<i64: 32, 128>}, {pipeline_mode = #tpu.pipeline_mode<synchronous>, transform_indices = @transform_6, window_bounds = array<i64: 1, 128>}, {transform_indices = @transform_7, window_bounds = array<i64: 8, 128>}]} {
    %c0 = arith.constant 0 : index
    %c0_0 = arith.constant 0 : index
    %0 = vector.load %arg1[%c0, %c0_0] : memref<8x16xf32, #tpu.memory_space<vmem>>, vector<8x16xf32>
    %1 = arith.truncf %0 : vector<8x16xf32> to vector<8x16xbf16>
    %c0_1 = arith.constant 0 : index
    %c0_2 = arith.constant 0 : index
    %2 = vector.load %arg2[%c0_1, %c0_2] : memref<16x32xbf16, #tpu.memory_space<vmem>>, vector<16x32xbf16>
    %cst = arith.constant dense<0.000000e+00> : vector<8x32xf32>
    %3 = tpu.matmul %1, %2, %cst {dimension_numbers = #tpu.dot_dimension_numbers<[1], [0], [0], [1], [0, 0, 1, 1], [], []>} : vector<8x16xbf16>, vector<16x32xbf16>, vector<8x32xf32> -> vector<8x32xf32>
    %c0_3 = arith.constant 0 : index
    %c0_4 = arith.constant 0 : index
    %4 = vector.load %arg3[%c0_3, %c0_4] : memref<1x32xf32, #tpu.memory_space<vmem>>, vector<1x32xf32>
    %5 = vector.broadcast %4 : vector<1x32xf32> to vector<8x32xf32>
    %6 = arith.addf %3, %5 : vector<8x32xf32>
    %cst_5 = arith.constant 0.000000e+00 : f32
    %7 = vector.broadcast %cst_5 : f32 to vector<8x32xf32>
    %8 = arith.maximumf %6, %7 : vector<8x32xf32>
    %9 = arith.truncf %8 : vector<8x32xf32> to vector<8x32xbf16>
    %c0_6 = arith.constant 0 : index
    %c0_7 = arith.constant 0 : index
    %10 = vector.load %arg4[%c0_6, %c0_7] : memref<32x32xbf16, #tpu.memory_space<vmem>>, vector<32x32xbf16>
    %cst_8 = arith.constant dense<0.000000e+00> : vector<8x32xf32>
    %11 = tpu.matmul %9, %10, %cst_8 {dimension_numbers = #tpu.dot_dimension_numbers<[1], [0], [0], [1], [0, 0, 1, 1], [], []>} : vector<8x32xbf16>, vector<32x32xbf16>, vector<8x32xf32> -> vector<8x32xf32>
    %c0_9 = arith.constant 0 : index
    %c0_10 = arith.constant 0 : index
    %12 = vector.load %arg5[%c0_9, %c0_10] : memref<1x32xf32, #tpu.memory_space<vmem>>, vector<1x32xf32>
    %13 = vector.broadcast %12 : vector<1x32xf32> to vector<8x32xf32>
    %14 = arith.addf %11, %13 : vector<8x32xf32>
    %cst_11 = arith.constant 0.000000e+00 : f32
    %15 = vector.broadcast %cst_11 : f32 to vector<8x32xf32>
    %16 = arith.maximumf %14, %15 : vector<8x32xf32>
    %17 = arith.truncf %16 : vector<8x32xf32> to vector<8x32xbf16>
    %c0_12 = arith.constant 0 : index
    %c0_13 = arith.constant 0 : index
    %18 = vector.load %arg6[%c0_12, %c0_13] : memref<32x128xbf16, #tpu.memory_space<vmem>>, vector<32x128xbf16>
    %cst_14 = arith.constant dense<0.000000e+00> : vector<8x128xf32>
    %19 = tpu.matmul %17, %18, %cst_14 {dimension_numbers = #tpu.dot_dimension_numbers<[1], [0], [0], [1], [0, 0, 1, 1], [], []>} : vector<8x32xbf16>, vector<32x128xbf16>, vector<8x128xf32> -> vector<8x128xf32>
    %c0_15 = arith.constant 0 : index
    %c0_16 = arith.constant 0 : index
    %20 = vector.load %arg7[%c0_15, %c0_16] : memref<1x128xf32, #tpu.memory_space<vmem>>, vector<1x128xf32>
    %21 = vector.broadcast %20 : vector<1x128xf32> to vector<8x128xf32>
    %22 = arith.addf %19, %21 : vector<8x128xf32>
    %23 = tpu.iota {dimensions = array<i32: 1>} : vector<8x128xi32>
    %c8_i32 = arith.constant 8 : i32
    %24 = vector.broadcast %c8_i32 : i32 to vector<8x128xi32>
    %25 = arith.cmpi sge, %23, %24 : vector<8x128xi32>
    %c16_i32 = arith.constant 16 : i32
    %26 = vector.broadcast %c16_i32 : i32 to vector<8x128xi32>
    %27 = arith.cmpi slt, %23, %26 : vector<8x128xi32>
    %28 = arith.andi %25, %27 : vector<8x128xi1>
    %cst_17 = arith.constant -2.000000e+01 : f32
    %cst_18 = arith.constant 2.000000e+00 : f32
    %29 = vector.broadcast %cst_17 : f32 to vector<8x128xf32>
    %30 = arith.maximumf %29, %22 : vector<8x128xf32>
    %31 = vector.broadcast %cst_18 : f32 to vector<8x128xf32>
    %32 = arith.minimumf %31, %30 : vector<8x128xf32>
    %33 = arith.select %28, %32, %22 : vector<8x128xi1>, vector<8x128xf32>
    %c0_19 = arith.constant 0 : index
    %c0_20 = arith.constant 0 : index
    %34 = vector.load %arg8[%c0_19, %c0_20] : memref<8x128xf32, #tpu.memory_space<vmem>>, vector<8x128xf32>
    tpu.vector_store %arg8[%c0_19, %c0_20], %33 {strides = array<i32>} : memref<8x128xf32, #tpu.memory_space<vmem>>, vector<8x128xf32>,
    return
  }
  func.func @transform_0(%arg0: i32) -> (i32, i32) {
    %c0_i32 = arith.constant 0 : i32
    %c0_i32_0 = arith.constant 0 : i32
    return %arg0, %c0_i32 : i32, i32
  }
  func.func @transform_1(%arg0: i32) -> (i32, i32) {
    %c0_i32 = arith.constant 0 : i32
    %c0_i32_0 = arith.constant 0 : i32
    %c0_i32_1 = arith.constant 0 : i32
    return %c0_i32, %c0_i32_0 : i32, i32
  }
  func.func @transform_2(%arg0: i32) -> (i32, i32) {
    %c0_i32 = arith.constant 0 : i32
    %c0_i32_0 = arith.constant 0 : i32
    %c0_i32_1 = arith.constant 0 : i32
    return %c0_i32, %c0_i32_0 : i32, i32
  }
  func.func @transform_3(%arg0: i32) -> (i32, i32) {
    %c0_i32 = arith.constant 0 : i32
    %c0_i32_0 = arith.constant 0 : i32
    %c0_i32_1 = arith.constant 0 : i32
    return %c0_i32, %c0_i32_0 : i32, i32
  }
  func.func @transform_4(%arg0: i32) -> (i32, i32) {
    %c0_i32 = arith.constant 0 : i32
    %c0_i32_0 = arith.constant 0 : i32
    %c0_i32_1 = arith.constant 0 : i32
    return %c0_i32, %c0_i32_0 : i32, i32
  }
  func.func @transform_5(%arg0: i32) -> (i32, i32) {
    %c0_i32 = arith.constant 0 : i32
    %c0_i32_0 = arith.constant 0 : i32
    %c0_i32_1 = arith.constant 0 : i32
    return %c0_i32, %c0_i32_0 : i32, i32
  }
  func.func @transform_6(%arg0: i32) -> (i32, i32) {
    %c0_i32 = arith.constant 0 : i32
    %c0_i32_0 = arith.constant 0 : i32
    %c0_i32_1 = arith.constant 0 : i32
    return %c0_i32, %c0_i32_0 : i32, i32
  }
  func.func @transform_7(%arg0: i32) -> (i32, i32) {
    %c0_i32 = arith.constant 0 : i32
    %c0_i32_0 = arith.constant 0 : i32
    return %arg0, %c0_i32 : i32, i32
  }
}

</mosaic_0001>

<bundles_post_ra>
// kernel: tpu_custom_call.1
= control target key start
LH: loop header
LB: loop body
LE: loop exit
PB: predicated region body
PF: predicated region fallthrough
CT: control target
= control target key end

     0   :  { %12 = vsyncpa [#allocation3], 0  ;;  %s462_s0 = inlined_call_operand.hbm [shape: f32[8,16], index: 0, kind: input, shape index: {}]   ;;  %s463_s1 = inlined_call_operand.hbm [shape: bf16[16,32], index: 1, kind: input, shape index: {}]   ;;  %s464_s2 = inlined_call_operand.vmem [shape: f32[1,32], index: 2, kind: input, shape index: {}]   ;;  %s465_s3 = inlined_call_operand.hbm [shape: bf16[32,32], index: 3, kind: input, shape index: {}]   ;;  %s466_s4 = inlined_call_operand.vmem [shape: f32[1,32], index: 4, kind: input, shape index: {}]   ;;  %s467_s5 = inlined_call_operand.hbm [shape: bf16[32,128], index: 5, kind: input, shape index: {}]   ;;  %s468_s6 = inlined_call_operand.vmem [shape: f32[1,128], index: 6, kind: input, shape index: {}]   ;;  %s469_s7 = inlined_call_operand.hbm [shape: f32[8,128], index: 7, kind: output, shape index: {}]  }
   0x1   :  { %13 = vsyncpa [#allocation6], 0 }
   0x2   :  { %14 = vsyncpa [#allocation9], 0  ;;  %s31_s26 = sshll.u32 %s463_s1, 4  ;;  %s32_s26 = int_to_ptr.hbm [resolvable:$true] %s31_s26 }
   0x3   :  { %15 = vsyncpa [#allocation4], 0  ;;  %s391_s27 = smov [#allocation5]   ;;  %s21_s8 = sshll.u32 %s462_s0, 4  ;;  %s22_s8 = int_to_ptr.hbm [resolvable:$true] %s21_s8 }
   0x4   :  { %s33_s28 = sshll.u32 %s391_s27, 4  ;;  %s392_s9 = smov 64   ;;  %s34_s28 = int_to_ptr.vmem [resolvable:$true] %s33_s28 }
   0x5   :  { %s393_s10 = smov 4   ;;  %s394_s11 = smov [#allocation2]  }
   0x6   :  { %39 = dma.hbm_to_vmem [thread:$0]  %s32_s26, 128, %s34_s28, [#allocation6], %s392_s9, %s392_s9, %s393_s10  }
   0x7   :  { %s23_s12 = sshll.u32 %s394_s11, 4  ;;  %s46_s15 = sshll.u32 %s465_s3, 4  ;;  %s24_s12 = int_to_ptr.vmem [resolvable:$true] %s23_s12  ;;  %s47_s15 = int_to_ptr.hbm [resolvable:$true] %s46_s15 }
   0x8   :  { %26 = dma.hbm_to_vmem [thread:$0]  %s22_s8, 128, %s24_s12, [#allocation3]  }
   0x9   :  { %s61_s17 = sshll.u32 %s467_s5, 4  ;;  %s395_s18 = smov [#allocation7]   ;;  %s62_s17 = int_to_ptr.hbm [resolvable:$true] %s61_s17 }
   0xa   :  { %s48_s19 = sshll.u32 %s395_s18, 4  ;;  %s396_s0 = smov [#allocation8]   ;;  %s49_s19 = int_to_ptr.vmem [resolvable:$true] %s48_s19 }
   0xb   :  { %54 = dma.hbm_to_vmem [thread:$0]  %s47_s15, 256, %s49_s19, [#allocation6], %s392_s9, %s392_s9, %s393_s10  }
   0xc   :  { %s63_s20 = sshll.u32 %s396_s0, 4  ;;  %s64_s20 = int_to_ptr.vmem [resolvable:$true] %s63_s20 }
   0xd   :  { %69 = dma.hbm_to_vmem [thread:$0]  %s62_s17, 256, %s64_s20, [#allocation9], %s392_s9, %s392_s9, %s393_s10  }
   0xe   :  { %383 = dma.done.wait [#allocation3], 128  }
   0xf   :  { %384 = vsyncadd [#allocation3], 4294967168 }
  0x10   :  { %385 = dma.done.wait [#allocation6], 384  }
  0x11   :  { %386 = vsyncadd [#allocation6], 4294966912 }
  0x12   :  { %387 = dma.done.wait [#allocation9], 256  }
  0x13   :  { %388 = vsyncadd [#allocation9], 4294967040  ;;  %v248_v0 = vld [vmem:[#allocation5] sm:$0xff]  ;;  %v89_v1 = vld [vmem:[#allocation2] sm:$0xff]  ;;  %vm103_vm0 = vcmask 130048   ;;  %vm142_vm1 = vcmask 261120   ;;  %v197_v19 = vlaneseq }
  0x14   :  { %v90_v2 = vpack.c.bf16 %v89_v1, %v89_v1  ;;  %114 = vmatpush.bf16.msra.mxu0 %v248_v0  ;;  %v250_v3 = vld [vmem:[#allocation7 + $0x8] sm:$0xff]  ;;  %v249_v4 = vld [vmem:[#allocation7] sm:$0xff]  ;;  %v260_v5 = vld [vmem:[%s464_s2] ss:$0 sm:$0xff]  ;;  %s397_s24 = smov [#allocation10]   ;;  %s213_s27 = sshll.u32 %s469_s7, 4  ;;  %s214_s27 = int_to_ptr.hbm [resolvable:$true] %s213_s27 }
  0x15   :  { %152 = vmatpush.bf16.msra.mxu1 %v250_v3  ;;  %v252_v11 = vld [vmem:[#allocation8 + $0x8] sm:$0xff]  ;;  %v251_v12 = vld [vmem:[#allocation8] sm:$0xff]  ;;  %v198_v21 = vand.u32 127, %v197_v19  ;;  %s211_s25 = sshll.u32 %s397_s24, 4  ;;  %s212_s25 = int_to_ptr.vmem [resolvable:$true] %s211_s25 }
  0x16   :  { %190 = vmatpush.bf16.msra.mxu2 %v252_v11  ;;  %v261_v13 = vld [vmem:[%s466_s4] ss:$0 sm:$0xff] }
  0x17   :  { %229 = vmatmul.msk.bf16.vlgmr.msra.gmra.mxu0 %vm103_vm0, %v90_v2  ;;  %v262_v20 = vld [vmem:[%s468_s6] ss:$0 sm:$0xff]  ;;  %vm199_vm2 = vcmp.ge.s32.totalorder %v198_v21, 8  ;;  %vm200_vm3 = vcmp.lt.s32.totalorder %v198_v21, 16 }
  0x18   :  { %vm201_vm4 = vmand %vm199_vm2, %vm200_vm3 }
  0x19   :  { %153 = vmatpush.bf16.msra.mxu1 %v249_v4 }
  0x1a   :  { %191 = vmatpush.bf16.msra.mxu2 %v251_v12 }
  0x94   :  { %v116_v6 = vpop.f32.mrf.mxu0 }
  0x95   :  { %v117_v7 = vadd.f32 %v260_v5, %v116_v6 }
  0x97   :  { %v120_v8 = vmax.f32 %v117_v7, 0.0 }
  0x99   :  { %v121_v9 = vpack.c.bf16 %v120_v8, %v120_v8 }
  0x9b   :  { %238 = vmatmul.msk.bf16.vlgmr.msra.gmra.mxu1 %vm142_vm1, %v121_v9 }
  0x9c   :  { %v118_v10 = vpop.f32.mrf.mxu0 }
 0x118   :  { %v155_v14 = vpop.f32.mrf.mxu1 }
 0x119   :  { %v156_v15 = vadd.f32 %v261_v13, %v155_v14 }
 0x11b   :  { %v159_v16 = vmax.f32 %v156_v15, 0.0 }
 0x11d   :  { %v160_v17 = vpack.c.bf16 %v159_v16, %v159_v16 }
 0x11f   :  { %247 = vmatmul.msk.bf16.vlgmr.msra.gmra.mxu2 %vm142_vm1, %v160_v17 }
 0x120   :  { %v157_v18 = vpop.f32.mrf.mxu1 }
 0x1a2   :  { %v193_v22 = vpop.f32.mrf.mxu2 }
 0x1a3   :  { %v194_v23 = vadd.f32 %v262_v20, %v193_v22 }
 0x1a5   :  { %v202_v24 = vmax.f32 %v194_v23, -20.0 }
 0x1a7   :  { %v203_v25 = vmin.f32 %v202_v24, 2.0 }
 0x1a9   :  { %v204_v26 = vsel %vm201_vm4, %v203_v25, %v194_v23 }
 0x1aa   :  { %v195_v27 = vpop.f32.mrf.mxu2  ;;  %205 = vst [vmem:[#allocation10] sm:$0xff] %v204_v26 }
 0x1ab   :  { %216 = dma.vmem_to_hbm [thread:$0]  %s212_s25, 128, %s214_s27, [#allocation4]  }
 0x1ac   :  { %389 = dma.done.wait [#allocation4], 128  }
 0x1ad   :  { %390 = vsyncadd [#allocation4], 4294967168 }
 0x1ae   :  { %221 = vsyncpa [#allocation3], 1 }
 0x1af   :  { %222 = vsyncpa [#allocation6], 1 }
 0x1b0   :  { %223 = vsyncpa [#allocation9], 1 }
 0x1b1   :  { %224 = vsyncpa [#allocation4], 1 }

</bundles_post_ra>
